<compile_context>
chip_gen: v5e
topology: v5e:2x2
jax: 0.10.0
libtpu: 0.0.40
codegen_flags: <defaults>
</compile_context>

<pallas_src>
import jax
import jax.numpy as jnp
from jax.experimental import pallas as pl
from jax.experimental.pallas import tpu as pltpu

EPS = 1e-5

# f32 passes the 5e-3 check vs. the HIGHEST-precision reference.  Set to jnp.bfloat16 on
# v6e/v7x (activations + banded weights only) if the accuracy budget allows.
COMPUTE_DTYPE = jnp.float32


# --------------------------------------------------------------------------------------
# Kernels
# --------------------------------------------------------------------------------------
def _conv3x3_one_matmul(act, bw_ref):
    """3x3 'same' conv of a (nb, H, K) slab as ONE MXU matmul.

    LHS columns are ordered [row h-1 | row h | row h+1] (each K=W*Cin wide), matching the
    row order of the stacked banded weight matrix bw_ref (3*K, W*Cout).  Vertical zero
    padding is realized by concatenating a zero row; horizontal zero padding is absorbed
    into bw (out-of-range dx taps are simply omitted).  Returns (nb*H, W*Cout) float32.
    """
    nb, H, K = act.shape
    z = jnp.zeros((nb, 1, K), act.dtype)
    top = jnp.concatenate([z, act[:, :H - 1, :]], axis=1)   # input row h-1  (dy = 0 tap)
    bot = jnp.concatenate([act[:, 1:, :], z], axis=1)       # input row h+1  (dy = 2 tap)
    lhs = jnp.concatenate([top, act, bot], axis=-1).reshape(nb * H, 3 * K)
    return jnp.dot(lhs.astype(bw_ref.dtype), bw_ref[...],
                   preferred_element_type=jnp.float32)


def _conv_stats_kernel(x_ref, bw_ref, h_ref, stats_ref):
    """conv1 (pre-BN) for a block of nb images + per-lane (sum, sum_sq) partial stats."""
    nb, H, _ = x_ref.shape
    acc = _conv3x3_one_matmul(x_ref[...], bw_ref)            # (nb*H, W*Cmid) f32
    h_ref[...] = acc.reshape(nb, H, acc.shape[-1]).astype(h_ref.dtype)
    stats_ref[0:1, :] = jnp.sum(acc, axis=0, keepdims=True)
    stats_ref[1:2, :] = jnp.sum(acc * acc, axis=0, keepdims=True)


def _bn_relu_conv_stats_kernel(h1_ref, a_ref, c_ref, bw_ref, h2_ref, stats_ref):
    """BN1 (pre-folded lane-tiled scale/shift) + ReLU + conv2 + partial stats."""
    nb, H, _ = h1_ref.shape
    act = jnp.maximum(h1_ref[...].astype(jnp.float32) * a_ref[...] + c_ref[...], 0.0)
    acc = _conv3x3_one_matmul(act, bw_ref)                    # (nb*H, W*Cout) f32
    h2_ref[...] = acc.reshape(nb, H, acc.shape[-1]).astype(h2_ref.dtype)
    stats_ref[0:1, :] = jnp.sum(acc, axis=0, keepdims=True)
    stats_ref[1:2, :] = jnp.sum(acc * acc, axis=0, keepdims=True)


# --------------------------------------------------------------------------------------
# Wrapper-side packing helpers (plain JAX, trace-time only)
# --------------------------------------------------------------------------------------
def _col_selector(W, dx):
    """(W, W) column selector for horizontal tap dx; out-of-range taps are omitted."""
    S = jnp.zeros((W, W), jnp.float32)
    for w in range(W):
        t = w + dx - 1                        # input column for output column w
        if 0 <= t < W:
            S = S.at[t, w].set(1.0)
    return S


def _banded_weights(w, W):
    """(Cout, Cin, 3, 3) conv weights -> stacked banded matrix (3*W*Cin, W*Cout)."""
    mats = []
    for dy in range(3):
        B = None
        for dx in range(3):
            wk = jnp.transpose(w[:, :, dy, dx])               # (Cin, Cout)
            term = jnp.kron(_col_selector(W, dx), wk)         # (W*Cin, W*Cout)
            B = term if B is None else B + term
        mats.append(B)
    return jnp.concatenate(mats, axis=0).astype(COMPUTE_DTYPE)


def _bn_fold(stats, gamma, beta, count, W, C):
    """Fold per-block (sum, sum_sq) partials into per-channel BN scale/shift (f32)."""
    s = jnp.sum(stats, axis=0).reshape(2, W, C).sum(axis=1)    # (2, C)
    mean = s[0] / count
    var = jnp.maximum(s[1] / count - mean * mean, 0.0)         # one-pass, clamped
    a = gamma * jax.lax.rsqrt(var + EPS)
    c = beta - mean * a
    return a, c


def _pick_nb(N, H, target_m=256):
    """Largest divisor of N such that nb*H <= target_m (fills the MXU M dimension)."""
    nb = max(1, min(N, max(1, target_m // max(H, 1))))
    while N % nb:
        nb -= 1
    return nb


# --------------------------------------------------------------------------------------
# DoubleConv forward
# --------------------------------------------------------------------------------------
def double_conv(x_nchw, params):
    """Pallas implementation of DoubleConv.forward.  x_nchw: (N, Cin, H, W) f32."""
    w1, _b1, g1, be1, w2, _b2, g2, be2 = params   # conv biases cancel under training BN
    N, Cin, H, W = x_nchw.shape
    Cmid, Cout = w1.shape[0], w2.shape[0]
    K1, M1 = W * Cin, W * Cmid
    K2, M2 = W * Cmid, W * Cout

    # Layout prep: NCHW -> lane-dense (H, W*C) slabs; banded weight packing.
    x = (jnp.transpose(x_nchw, (0, 2, 3, 1)).reshape(N, H, K1).astype(COMPUTE_DTYPE))
    B1 = _banded_weights(w1, W)                               # (3*K1, M1)
    B2 = _banded_weights(w2, W)                               # (3*K2, M2)

    nb = _pick_nb(N, H)
    nblk = N // nb
    cparams = pltpu.CompilerParams(dimension_semantics=("parallel",),
                                   vmem_limit_bytes=32 * 1024 * 1024)

    # ---- pass A: conv1 + partial BN stats (nb images per grid step). ----
    h1, st1 = pl.pallas_call(
        _conv_stats_kernel,
        grid=(nblk,),
        in_specs=[
            pl.BlockSpec((nb, H, K1), lambda n: (n, 0, 0)),
            pl.BlockSpec((3 * K1, M1), lambda n: (0, 0)),
        ],
        out_specs=[
            pl.BlockSpec((nb, H, M1), lambda n: (n, 0, 0)),
            pl.BlockSpec((None, 2, M1), lambda n: (n, 0, 0)),
        ],
        out_shape=[
            jax.ShapeDtypeStruct((N, H, M1), COMPUTE_DTYPE),
            jax.ShapeDtypeStruct((nblk, 2, M1), jnp.float32),
        ],
        compiler_params=cparams,
    )(x, B1)
    a1, c1 = _bn_fold(st1, g1, be1, N * H * W, W, Cmid)
    a1_row = jnp.tile(a1, W).reshape(1, K2)                   # lane-tiled (w*Cmid + c)
    c1_row = jnp.tile(c1, W).reshape(1, K2)

    # ---- pass B: BN1 + ReLU + conv2 + partial BN stats. ----
    h2, st2 = pl.pallas_call(
        _bn_relu_conv_stats_kernel,
        grid=(nblk,),
        in_specs=[
            pl.BlockSpec((nb, H, K2), lambda n: (n, 0, 0)),
            pl.BlockSpec((1, K2), lambda n: (0, 0)),
            pl.BlockSpec((1, K2), lambda n: (0, 0)),
            pl.BlockSpec((3 * K2, M2), lambda n: (0, 0)),
        ],
        out_specs=[
            pl.BlockSpec((nb, H, M2), lambda n: (n, 0, 0)),
            pl.BlockSpec((None, 2, M2), lambda n: (n, 0, 0)),
        ],
        out_shape=[
            jax.ShapeDtypeStruct((N, H, M2), COMPUTE_DTYPE),
            jax.ShapeDtypeStruct((nblk, 2, M2), jnp.float32),
        ],
        compiler_params=cparams,
    )(h1, a1_row, c1_row, B2)
    a2, c2 = _bn_fold(st2, g2, be2, N * H * W, W, Cout)

    # ---- final BN2 + ReLU: plain JAX, fused by XLA with the reshape/transpose. ----
    y = h2.reshape(N, H, W, Cout).astype(jnp.float32)
    y = jnp.maximum(y * a2 + c2, 0.0)
    return jnp.transpose(y, (0, 3, 1, 2))


# --------------------------------------------------------------------------------------
# Params + reference
# --------------------------------------------------------------------------------------
def init_params(key, in_channels, out_channels, mid_channels=None):
    """Deterministic synthetic parameters with the same shapes as the PyTorch module."""
    if not mid_channels:
        mid_channels = out_channels
    ks = jax.random.split(key, 8)
    w1 = 0.1 * jax.random.normal(ks[0], (mid_channels, in_channels, 3, 3), jnp.float32)
    b1 = 0.1 * jax.random.normal(ks[1], (mid_channels,), jnp.float32)
    g1 = 1.0 + 0.1 * jax.random.normal(ks[2], (mid_channels,), jnp.float32)
    be1 = 0.1 * jax.random.normal(ks[3], (mid_channels,), jnp.float32)
    w2 = 0.1 * jax.random.normal(ks[4], (out_channels, mid_channels, 3, 3), jnp.float32)
    b2 = 0.1 * jax.random.normal(ks[5], (out_channels,), jnp.float32)
    g2 = 1.0 + 0.1 * jax.random.normal(ks[6], (out_channels,), jnp.float32)
    be2 = 0.1 * jax.random.normal(ks[7], (out_channels,), jnp.float32)
    return (w1, b1, g1, be1, w2, b2, g2, be2)


def reference(x, params):
    """Pure-JAX reference matching the PyTorch forward (training-mode BN)."""
    w1, b1, g1, be1, w2, b2, g2, be2 = params

    def conv(x, w, b):
        y = jax.lax.conv_general_dilated(
            x, w, window_strides=(1, 1), padding=((1, 1), (1, 1)),
            dimension_numbers=("NCHW", "OIHW", "NCHW"),
            precision=jax.lax.Precision.HIGHEST)
        return y + b[None, :, None, None]

    def bn_relu(y, g, be):
        mean = jnp.mean(y, axis=(0, 2, 3), keepdims=True)
        var = jnp.mean((y - mean) ** 2, axis=(0, 2, 3), keepdims=True)
        yhat = (y - mean) * jax.lax.rsqrt(var + EPS)
        return jnp.maximum(yhat * g[None, :, None, None] + be[None, :, None, None], 0.0)

    y = bn_relu(conv(x, w1, b1), g1, be1)
    return bn_relu(conv(y, w2, b2), g2, be2)


if __name__ == "__main__":
    key = jax.random.PRNGKey(0)
    kx, kp = jax.random.split(key)

    N, Cin, H, W = 2, 4, 16, 16
    Cout = 8  # mid_channels defaults to out_channels

    x = jax.random.normal(kx, (N, Cin, H, W), jnp.float32)
    params = init_params(kp, Cin, Cout)

    y = double_conv(x, params)
    jax.block_until_ready(y)

    assert y.shape == (N, Cout, H, W)
    y_ref = reference(x, params)
    err = float(jnp.max(jnp.abs(y - y_ref)))
    assert err < 5e-3, f"max abs error {err}"

    print("KERNEL_OK")
</pallas_src>

<mosaic_0001>
module attributes {stable_mosaic.version = 11 : i64} {
  func.func @_conv_stats_kernel(%arg0: i32, %arg1: memref<2x16x64xf32, #tpu.memory_space<vmem>>, %arg2: memref<192x128xf32, #tpu.memory_space<vmem>>, %arg3: memref<2x16x128xf32, #tpu.memory_space<vmem>>, %arg4: memref<1x2x128xf32, #tpu.memory_space<vmem>>) attributes {dimension_semantics = [#tpu.dimension_semantics<parallel>], iteration_bounds = array<i64: 1>, scalar_prefetch = 0 : i64, scratch_operands = 0 : i64, tpu.core_type = #tpu.core_type<tc>, window_params = [{transform_indices = @transform_0, window_bounds = array<i64: 2, 16, 64>}, {pipeline_mode = #tpu.pipeline_mode<synchronous>, transform_indices = @transform_1, window_bounds = array<i64: 192, 128>}, {transform_indices = @transform_2, window_bounds = array<i64: 2, 16, 128>}, {transform_indices = @transform_3, window_bounds = array<i64: 1, 2, 128>}]} {
    %c0 = arith.constant 0 : index
    %c0_0 = arith.constant 0 : index
    %c0_1 = arith.constant 0 : index
    %0 = vector.load %arg1[%c0, %c0_0, %c0_1] : memref<2x16x64xf32, #tpu.memory_space<vmem>>, vector<2x16x64xf32>
    %cst = arith.constant 0.000000e+00 : f32
    %1 = vector.broadcast %cst : f32 to vector<2x1x64xf32>
    %2 = vector.extract_strided_slice %0 {offsets = [0, 0, 0], sizes = [2, 15, 64], strides = [1, 1, 1]} : vector<2x16x64xf32> to vector<2x15x64xf32>
    %3 = tpu.concatenate %1, %2 in 1 : vector<2x1x64xf32>, vector<2x15x64xf32> -> vector<2x16x64xf32>
    %4 = vector.extract_strided_slice %0 {offsets = [0, 1, 0], sizes = [2, 15, 64], strides = [1, 1, 1]} : vector<2x16x64xf32> to vector<2x15x64xf32>
    %5 = tpu.concatenate %4, %1 in 1 : vector<2x15x64xf32>, vector<2x1x64xf32> -> vector<2x16x64xf32>
    %6 = tpu.concatenate %3, %0, %5 in 2 : vector<2x16x64xf32>, vector<2x16x64xf32>, vector<2x16x64xf32> -> vector<2x16x192xf32>
    %7 = vector.shape_cast %6 : vector<2x16x192xf32> to vector<32x192xf32>
    %c0_2 = arith.constant 0 : index
    %c0_3 = arith.constant 0 : index
    %8 = vector.load %arg2[%c0_2, %c0_3] : memref<192x128xf32, #tpu.memory_space<vmem>>, vector<192x128xf32>
    %cst_4 = arith.constant dense<0.000000e+00> : vector<32x128xf32>
    %9 = tpu.matmul %7, %8, %cst_4 {dimension_numbers = #tpu.dot_dimension_numbers<[1], [0], [0], [1], [0, 0, 1, 1], [], []>} : vector<32x192xf32>, vector<192x128xf32>, vector<32x128xf32> -> vector<32x128xf32>
    %10 = vector.shape_cast %9 : vector<32x128xf32> to vector<2x16x128xf32>
    %c0_5 = arith.constant 0 : index
    %c0_6 = arith.constant 0 : index
    %c0_7 = arith.constant 0 : index
    %11 = vector.load %arg3[%c0_5, %c0_6, %c0_7] : memref<2x16x128xf32, #tpu.memory_space<vmem>>, vector<2x16x128xf32>
    tpu.vector_store %arg3[%c0_5, %c0_6, %c0_7], %10 {strides = array<i32>} : memref<2x16x128xf32, #tpu.memory_space<vmem>>, vector<2x16x128xf32>,
    %cst_8 = arith.constant dense<0.000000e+00> : vector<128xf32>
    %12 = vector.multi_reduction <add>, %9, %cst_8 [0] : vector<32x128xf32> to vector<128xf32>
    %13 = vector.shape_cast %12 : vector<128xf32> to vector<1x128xf32>
    %c0_9 = arith.constant 0 : index
    %c0_10 = arith.constant 0 : index
    %c0_11 = arith.constant 0 : index
    %14 = vector.load %arg4[%c0_9, %c0_10, %c0_11] : memref<1x2x128xf32, #tpu.memory_space<vmem>>, vector<1x1x128xf32>
    %15 = vector.shape_cast %14 : vector<1x1x128xf32> to vector<1x128xf32>
    %16 = vector.shape_cast %13 : vector<1x128xf32> to vector<1x1x128xf32>
    tpu.vector_store %arg4[%c0_9, %c0_10, %c0_11], %16 {strides = array<i32>} : memref<1x2x128xf32, #tpu.memory_space<vmem>>, vector<1x1x128xf32>,
    %17 = arith.mulf %9, %9 : vector<32x128xf32>
    %cst_12 = arith.constant dense<0.000000e+00> : vector<128xf32>
    %18 = vector.multi_reduction <add>, %17, %cst_12 [0] : vector<32x128xf32> to vector<128xf32>
    %19 = vector.shape_cast %18 : vector<128xf32> to vector<1x128xf32>
    %c0_13 = arith.constant 0 : index
    %c1 = arith.constant 1 : index
    %c0_14 = arith.constant 0 : index
    %20 = vector.load %arg4[%c0_13, %c1, %c0_14] : memref<1x2x128xf32, #tpu.memory_space<vmem>>, vector<1x1x128xf32>
    %21 = vector.shape_cast %20 : vector<1x1x128xf32> to vector<1x128xf32>
    %22 = vector.shape_cast %19 : vector<1x128xf32> to vector<1x1x128xf32>
    tpu.vector_store %arg4[%c0_13, %c1, %c0_14], %22 {strides = array<i32>} : memref<1x2x128xf32, #tpu.memory_space<vmem>>, vector<1x1x128xf32>,
    return
  }
  func.func @transform_0(%arg0: i32) -> (i32, i32, i32) {
    %c0_i32 = arith.constant 0 : i32
    %c0_i32_0 = arith.constant 0 : i32
    %c0_i32_1 = arith.constant 0 : i32
    return %arg0, %c0_i32, %c0_i32_0 : i32, i32, i32
  }
  func.func @transform_1(%arg0: i32) -> (i32, i32) {
    %c0_i32 = arith.constant 0 : i32
    %c0_i32_0 = arith.constant 0 : i32
    %c0_i32_1 = arith.constant 0 : i32
    return %c0_i32, %c0_i32_0 : i32, i32
  }
  func.func @transform_2(%arg0: i32) -> (i32, i32, i32) {
    %c0_i32 = arith.constant 0 : i32
    %c0_i32_0 = arith.constant 0 : i32
    %c0_i32_1 = arith.constant 0 : i32
    return %arg0, %c0_i32, %c0_i32_0 : i32, i32, i32
  }
  func.func @transform_3(%arg0: i32) -> (i32, i32, i32) {
    %c0_i32 = arith.constant 0 : i32
    %c0_i32_0 = arith.constant 0 : i32
    %c0_i32_1 = arith.constant 0 : i32
    return %arg0, %c0_i32, %c0_i32_0 : i32, i32, i32
  }
}

</mosaic_0001>

<bundles_post_ra>
// kernel: tpu_custom_call.1
= control target key start
LH: loop header
LB: loop body
LE: loop exit
PB: predicated region body
PF: predicated region fallthrough
CT: control target
= control target key end

     0   :  { %9 = vsyncpa [#allocation3], 0  ;;  %s488_s0 = inlined_call_operand.hbm [shape: f32[2,16,64], index: 0, kind: input, shape index: {}]   ;;  %s489_s1 = inlined_call_operand.hbm [shape: f32[192,128], index: 1, kind: input, shape index: {}]   ;;  %s490_s2 = inlined_call_operand.hbm [shape: f32[2,16,128], index: 2, kind: output, shape index: {0}]   ;;  %s491_s3 = inlined_call_operand.hbm [shape: f32[1,2,128], index: 3, kind: output, shape index: {1}]  }
   0x1   :  { %10 = vsyncpa [#allocation6], 0 }
   0x2   :  { %11 = vsyncpa [#allocation4], 0 }
   0x3   :  { %12 = vsyncpa [#allocation9], 0  ;;  %s17_s14 = sshll.u32 %s488_s0, 4  ;;  %s404_s15 = smov [#allocation2]   ;;  %s18_s14 = int_to_ptr.hbm [resolvable:$true] %s17_s14 }
   0x4   :  { %s19_s16 = sshll.u32 %s404_s15, 4  ;;  %s30_s19 = sshll.u32 %s489_s1, 4  ;;  %s20_s16 = int_to_ptr.vmem [resolvable:$true] %s19_s16  ;;  %s31_s19 = int_to_ptr.hbm [resolvable:$true] %s30_s19 }
   0x5   :  { %s405_s20 = smov 128   ;;  %s406_s21 = smov 8  }
   0x6   :  { %25 = dma.hbm_to_vmem [thread:$0]  %s18_s14, 512, %s20_s16, [#allocation3], %s405_s20, %s405_s20, %s406_s21  }
   0x7   :  { %s407_s22 = smov [#allocation5]  }
   0x8   :  { %s32_s23 = sshll.u32 %s407_s22, 4  ;;  %s33_s23 = int_to_ptr.vmem [resolvable:$true] %s32_s23 }
   0x9   :  { %38 = dma.hbm_to_vmem [thread:$0]  %s31_s19, 3072, %s33_s23, [#allocation6], %s405_s20, %s405_s20, %s406_s21  }
   0xa   :  { %396 = dma.done.wait [#allocation3], 512  }
   0xb   :  { %397 = vsyncadd [#allocation3], 4294966784 }
   0xc   :  { %398 = dma.done.wait [#allocation6], 3072  }
   0xd   :  { %399 = vsyncadd [#allocation6], 4294964224  ;;  %v443_v0 = vld [vmem:[#allocation2 + $0x10] sm:$0xff]  ;;  %v445_v1 = vld [vmem:[#allocation2] sm:$0xff]  ;;  %s408_s0 = smov 64   ;;  %vm68_vm0 = vcmask 1046528  }
   0xe   :  { %v447_v2 = vld [vmem:[#allocation2 + $0x18] sm:$0xff]  ;;  %83 = vrot.lane.b32.xlu0 %v443_v0, %s408_s0  ;;  %v110_v5 = vld [vmem:[#allocation5 + $0x70] sm:$0xff]  ;;  %v109_v6 = vld [vmem:[#allocation5 + $0x68] sm:$0xff]  ;;  %v69_v19 = vrot.slane %v445_v1, 1  ;;  %vm91_vm1 = vcmask 523264   ;;  %v72_v33 = vrot.slane %v443_v0, 1 }
   0xf   :  { %v111_v3 = vld [vmem:[#allocation5 + $0x78] sm:$0xff]  ;;  %v295_v4 = vpack.i.bf16 %v445_v1, %v447_v2  ;;  %v118_v8 = vld [vmem:[#allocation5 + $0xb0] sm:$0xff]  ;;  %v108_v9 = vld [vmem:[#allocation5 + $0x60] sm:$0xff]  ;;  %v73_v34 = vrot.slane %v447_v2, 1  ;;  %v60_v35 = vrot.slane %v447_v2, 7  ;;  %v59_v36 = vrot.slane %v443_v0, 7 }
  0x10   :  { %257 = vmatpush.msra.mxu3 %v111_v3  ;;  %130 = vmatpush.msra.mxu0 %v111_v3  ;;  %v119_v7 = vld [vmem:[#allocation5 + $0xb8] sm:$0xff]  ;;  %v452_v10 = vld [vmem:[#allocation2 + $0x8] sm:$0xff]  ;;  %v106_v13 = vld [vmem:[#allocation5 + $0x50] sm:$0xff]  ;;  %vm55_vm2 = vcmask 1040384   ;;  %v56_v41 = vrot.slane %v445_v1, 7  ;;  %s409_s1 = smov [#allocation7]  }
  0x11   :  { %256 = vmatpush.msra.mxu2 %v111_v3  ;;  %296 = vrot.lane.b32.xlu1 %v295_v4, %s408_s0  ;;  %v107_v11 = vld [vmem:[#allocation5 + $0x58] sm:$0xff]  ;;  %v117_v12 = vld [vmem:[#allocation5 + $0xa8] sm:$0xff]  ;;  %v116_v14 = vld [vmem:[#allocation5 + $0xa0] sm:$0xff]  ;;  %v70_v20 = vrot.slane %v452_v10, 1  ;;  %v74_v37 = vsel %vm68_vm0, %v72_v33, %v73_v34  ;;  %v61_v38 = vsel %vm55_vm2, %v59_v36, %v60_v35  ;;  %v78_v39 = vsel %vm68_vm0, %v73_v34, 0.0  ;;  %s220_s24 = sshll.u32 %s409_s1, 4  ;;  %s221_s24 = int_to_ptr.vmem [resolvable:$true] %s220_s24 }
  0x12   :  { %259 = vmatpush.msra.mxu3 %v110_v5  ;;  %131 = vmatpush.msra.mxu0 %v110_v5  ;;  %v105_v15 = vld [vmem:[#allocation5 + $0x48] sm:$0xff]  ;;  %v115_v16 = vld [vmem:[#allocation5 + $0x98] sm:$0xff]  ;;  %v104_v17 = vld [vmem:[#allocation5 + $0x40] sm:$0xff]  ;;  %v67_v40 = vsel %vm55_vm2, 0.0, %v59_v36  ;;  %v57_v44 = vrot.slane %v452_v10, 7  ;;  %v66_v46 = vsel %vm55_vm2, 0.0, %v56_v41 }
  0x13   :  { %167 = vmatpush.msra.mxu1 %v119_v7  ;;  %258 = vmatpush.msra.mxu2 %v110_v5  ;;  %v114_v18 = vld [vmem:[#allocation5 + $0x90] sm:$0xff]  ;;  %v103_v21 = vld [vmem:[#allocation5 + $0x38] sm:$0xff]  ;;  %v113_v22 = vld [vmem:[#allocation5 + $0x88] sm:$0xff]  ;;  %v71_v25 = vsel %vm68_vm0, %v69_v19, %v70_v20  ;;  %v77_v31 = vsel %vm68_vm0, %v70_v20, 0.0  ;;  %s222_s27 = sshll.u32 %s490_s2, 4  ;;  %s410_s2 = smov [#allocation8]   ;;  %s223_s27 = int_to_ptr.hbm [resolvable:$true] %s222_s27 }
  0x14   :  { %261 = vmatpush.msra.mxu3 %v109_v6  ;;  %132 = vmatpush.msra.mxu0 %v109_v6  ;;  %v102_v23 = vld [vmem:[#allocation5 + $0x30] sm:$0xff]  ;;  %v112_v24 = vld [vmem:[#allocation5 + $0x80] sm:$0xff]  ;;  %v101_v26 = vld [vmem:[#allocation5 + $0x28] sm:$0xff]  ;;  %v58_v50 = vsel %vm55_vm2, %v56_v41, %v57_v44  ;;  %s234_s28 = sshll.u32 %s410_s2, 4  ;;  %s236_s4 = sshll.u32 %s491_s3, 4  ;;  %s235_s28 = int_to_ptr.vmem [resolvable:$true] %s234_s28  ;;  %s237_s4 = int_to_ptr.hbm [resolvable:$true] %s236_s4 }
  0x15   :  { %168 = vmatpush.msra.mxu1 %v118_v8  ;;  %260 = vmatpush.msra.mxu2 %v109_v6  ;;  %v100_v27 = vld [vmem:[#allocation5 + $0x20] sm:$0xff]  ;;  %v99_v28 = vld [vmem:[#allocation5 + $0x18] sm:$0xff]  ;;  %v98_v29 = vld [vmem:[#allocation5 + $0x10] sm:$0xff] }
  0x16   :  { %263 = vmatpush.msra.mxu3 %v108_v9  ;;  %81 = vrot.lane.b32.xlu0 %v452_v10, %s408_s0  ;;  %v97_v30 = vld [vmem:[#allocation5 + $0x8] sm:$0xff]  ;;  %v96_v32 = vld [vmem:[#allocation5] sm:$0xff] }
  0x17   :  { %133 = vmatpush.msra.mxu0 %v108_v9  ;;  %169 = vmatpush.msra.mxu1 %v117_v12 }
  0x18   :  { %265 = vmatpush.msra.mxu3 %v107_v11  ;;  %262 = vmatpush.msra.mxu2 %v108_v9 }
  0x19   :  { %134 = vmatpush.msra.mxu0 %v107_v11  ;;  %170 = vmatpush.msra.mxu1 %v116_v14 }
  0x1a   :  { %267 = vmatpush.msra.mxu3 %v106_v13  ;;  %264 = vmatpush.msra.mxu2 %v107_v11 }
  0x1b   :  { %135 = vmatpush.msra.mxu0 %v106_v13  ;;  %171 = vmatpush.msra.mxu1 %v115_v16 }
  0x1c   :  { %269 = vmatpush.msra.mxu3 %v105_v15  ;;  %266 = vmatpush.msra.mxu2 %v106_v13 }
  0x1d   :  { %136 = vmatpush.msra.mxu0 %v105_v15  ;;  %172 = vmatpush.msra.mxu1 %v114_v18 }
  0x1e   :  { %271 = vmatpush.msra.mxu3 %v104_v17  ;;  %268 = vmatpush.msra.mxu2 %v105_v15 }
  0x1f   :  { %137 = vmatpush.msra.mxu0 %v104_v17  ;;  %173 = vmatpush.msra.mxu1 %v113_v22 }
  0x20   :  { %273 = vmatpush.msra.mxu3 %v103_v21  ;;  %270 = vmatpush.msra.mxu2 %v104_v17 }
  0x21   :  { %138 = vmatpush.msra.mxu0 %v103_v21  ;;  %174 = vmatpush.msra.mxu1 %v112_v24 }
  0x22   :  { %275 = vmatpush.msra.mxu3 %v102_v23  ;;  %252 = vmatmul.msk.f32.vlgmr.msra.gmra.mxu1 %vm91_vm1, %v71_v25 }
  0x23   :  { %139 = vmatpush.msra.mxu0 %v102_v23  ;;  %272 = vmatpush.msra.mxu2 %v103_v21 }
  0x24   :  { %277 = vmatpush.msra.mxu3 %v101_v26 }
  0x25   :  { %140 = vmatpush.msra.mxu0 %v101_v26  ;;  %274 = vmatpush.msra.mxu2 %v102_v23 }
  0x26   :  { %279 = vmatpush.msra.mxu3 %v100_v27 }
  0x27   :  { %141 = vmatpush.msra.mxu0 %v100_v27  ;;  %276 = vmatpush.msra.mxu2 %v101_v26 }
  0x28   :  { %281 = vmatpush.msra.mxu3 %v99_v28 }
  0x29   :  { %142 = vmatpush.msra.mxu0 %v99_v28  ;;  %278 = vmatpush.msra.mxu2 %v100_v27 }
  0x2a   :  { %283 = vmatpush.msra.mxu3 %v98_v29  ;;  %253 = vmatmul.msk.f32.gmra.mxu1 %vm91_vm1, %v77_v31 }
  0x2b   :  { %143 = vmatpush.msra.mxu0 %v98_v29  ;;  %280 = vmatpush.msra.mxu2 %v99_v28 }
  0x2c   :  { %285 = vmatpush.msra.mxu3 %v97_v30 }
  0x2d   :  { %144 = vmatpush.msra.mxu0 %v97_v30  ;;  %282 = vmatpush.msra.mxu2 %v98_v29 }
  0x2e   :  { %287 = vmatpush.msra.mxu3 %v96_v32 }
  0x2f   :  { %284 = vmatpush.msra.mxu2 %v97_v30  ;;  %145 = vmatpush.msra.mxu0 %v96_v32 }
  0x31   :  { %286 = vmatpush.msra.mxu2 %v96_v32 }
  0x32   :  { %254 = vmatmul.msk.f32.gmra.mxu1 %vm91_vm1, %v74_v37 }
  0x3a   :  { %255 = vmatmul.msk.f32.gmra.mxu1 %vm91_vm1, %v78_v39 }
  0x80   :  { %v84_v42 = vpop.permute.xlu0 %83 }
  0x81   :  { %v94_v43 = vsel %vm91_vm1, %v67_v40, %v84_v42 }
  0x82   :  { %152 = vmatmul.f32.vlgmr.msra.gmra.mxu3 %v94_v43 }
  0x83   :  { %v297_v45 = vpop.permute.xlu1 %296 }
  0x84   :  { %v299_v47 = vunpack.i.h.bf16 %v297_v45  ;;  %v298_v48 = vunpack.i.l.bf16 %v297_v45 }
  0x86   :  { %v92_v49 = vsel %vm91_vm1, %v66_v46, %v299_v47  ;;  %v95_v51 = vsel %vm91_vm1, %v61_v38, %v298_v48 }
  0x87   :  { %146 = vmatmul.f32.vlgmr.msra.gmra.mxu0 %v92_v49 }
  0x88   :  { %v82_v52 = vpop.permute.xlu0 %81 }
  0x89   :  { %v93_v53 = vsel %vm91_vm1, %v58_v50, %v82_v52 }
  0x8a   :  { %149 = vmatmul.f32.vlgmr.msra.gmra.mxu2 %v93_v53  ;;  %155 = vmatmul.f32.gmra.mxu3 %v95_v51 }
  0x9f   :  { %v176_v54 = vpop.f32.mrf.mxu1 }
  0xa7   :  { %v179_v55 = vpop.f32.mrf.mxu1 }
  0xaf   :  { %v182_v56 = vpop.f32.mrf.mxu1 }
  0xb7   :  { %v185_v61 = vpop.f32.mrf.mxu1 }
 0x104   :  { %v147_v57 = vpop.f32.mrf.mxu0 }
 0x105   :  { %v177_v58 = vadd.f32 %v176_v54, %v147_v57  ;;  %v153_v59 = vpop.f32.mrf.mxu3 }
 0x106   :  { %v183_v60 = vadd.f32 %v182_v56, %v153_v59 }
 0x107   :  { %188 = vst [vmem:[#allocation7] sm:$0xff] %v177_v58  ;;  %v202_v2 = vmul.f32 %v177_v58, %v177_v58 }
 0x108   :  { %190 = vst [vmem:[#allocation7 + $0x10] sm:$0xff] %v183_v60  ;;  %v204_v5 = vmul.f32 %v183_v60, %v183_v60 }
 0x10d   :  { %v150_v62 = vpop.f32.mrf.mxu2  ;;  %v156_v63 = vpop.f32.mrf.mxu3 }
 0x10e   :  { %v180_v0 = vadd.f32 %v179_v55, %v150_v62  ;;  %v186_v1 = vadd.f32 %v185_v61, %v156_v63 }
 0x110   :  { %189 = vst [vmem:[#allocation7 + $0x8] sm:$0xff] %v180_v0  ;;  %v192_v3 = vadd.f32 %v180_v0, %v177_v58  ;;  %v203_v4 = vmul.f32 %v180_v0, %v180_v0  ;;  %v205_v8 = vmul.f32 %v186_v1, %v186_v1 }
 0x111   :  { %191 = vst [vmem:[#allocation7 + $0x18] sm:$0xff] %v186_v1 }
 0x112   :  { %v206_v6 = vadd.f32 %v203_v4, %v202_v2  ;;  %v193_v7 = vadd.f32 %v192_v3, %v183_v60  ;;  %228 = dma.vmem_to_hbm [thread:$0]  %s221_s24, 512, %s223_s27, [#allocation4], %s405_s20, %s405_s20, %s406_s21  }
 0x114   :  { %v194_v9 = vadd.f32 %v193_v7, %v186_v1  ;;  %v207_v10 = vadd.f32 %v206_v6, %v204_v5 }
 0x116   :  { %v195_v11 = vrot.slane %v194_v9, 4  ;;  %v208_v12 = vadd.f32 %v207_v10, %v205_v8 }
 0x118   :  { %v196_v13 = vadd.f32 %v195_v11, %v194_v9  ;;  %v209_v14 = vrot.slane %v208_v12, 4 }
 0x11a   :  { %v197_v15 = vrot.slane %v196_v13, 2  ;;  %v210_v16 = vadd.f32 %v209_v14, %v208_v12 }
 0x11c   :  { %v198_v17 = vadd.f32 %v197_v15, %v196_v13  ;;  %v211_v18 = vrot.slane %v210_v16, 2 }
 0x11e   :  { %v199_v19 = vrot.slane %v198_v17, 1  ;;  %v212_v20 = vadd.f32 %v211_v18, %v210_v16 }
 0x120   :  { %v200_v21 = vadd.f32 %v199_v19, %v198_v17  ;;  %v213_v22 = vrot.slane %v212_v20, 1 }
 0x122   :  { %201 = vst [vmem:[#allocation8] sm:$0x1] %v200_v21  ;;  %v214_v23 = vadd.f32 %v213_v22, %v212_v20 }
 0x124   :  { %215 = vst [vmem:[#allocation8 + $0x1] sm:$0x1] %v214_v23 }
 0x125   :  { %239 = dma.vmem_to_hbm [thread:$0]  %s235_s28, 32, %s237_s4, [#allocation9]  }
 0x126   :  { %400 = dma.done.wait [#allocation4], 512  }
 0x127   :  { %401 = vsyncadd [#allocation4], 4294966784 }
 0x128   :  { %402 = dma.done.wait [#allocation9], 32  }
 0x129   :  { %403 = vsyncadd [#allocation9], 4294967264 }
 0x12a   :  { %248 = vsyncpa [#allocation3], 1 }
 0x12b   :  { %249 = vsyncpa [#allocation6], 1 }
 0x12c   :  { %250 = vsyncpa [#allocation4], 1 }
 0x12d   :  { %251 = vsyncpa [#allocation9], 1 }

</bundles_post_ra>
